<compile_context>
chip_gen: v7x
topology: tpu7x:2x2x1
jax: 0.10.0
libtpu: 0.0.40
codegen_flags: <defaults>
</compile_context>

<pallas_src>
import numpy as np
import jax
import jax.numpy as jnp
from jax.experimental import pallas as pl
from jax.experimental.pallas import tpu as pltpu


def _band_weights(L, L_out, kernel_size, stride, pad, grid_t, block_t, win):
    """Per-time-block banded AvgPool weights with replicate padding folded in.

    W3[tb, r, j] = weight of input row (s0(tb) + j) in output row
    (tb * block_t + r).  Rows past L_out are left zero (their output-block
    tail is dropped by Pallas on write-back).
    """
    inv_k = np.float32(1.0 / kernel_size)
    W = np.zeros((L_out, L), dtype=np.float32)
    t_idx = np.arange(L_out)
    for j in range(kernel_size):
        q = np.clip(t_idx * stride + j - pad, 0, L - 1)
        np.add.at(W, (t_idx, q), inv_k)      # edge rows accumulate multiplicity
    W3 = np.zeros((grid_t, block_t, win), dtype=np.float32)
    for tb in range(grid_t):
        r0 = tb * block_t
        r1 = min(r0 + block_t, L_out)
        s0 = min(max(r0 * stride - pad, 0), L - win)   # matches in-kernel s0
        W3[tb, : r1 - r0, :] = W[r0:r1, s0:s0 + win]
    return W3


def _make_kernel(L, pad, stride, win, block_b, block_t, grid_t):
    def kernel(w_ref, x_ref, o_ref):
        # w_ref: (1, block_t, win)            banded weights (f32)
        # x_ref: (block_b, L, block_c)        input tile (full time axis)
        # o_ref: (block_b, block_t, block_c)  output tile
        if grid_t == 1:
            s0 = 0
        else:
            t = pl.program_id(2)
            # Same formula used when building W3 in the wrapper.
            s0 = jnp.clip(t * (block_t * stride) - pad, 0, L - win)
        w = w_ref[0]                                     # (block_t, win) f32
        for b in range(block_b):                         # short unrolled loop
            xw = x_ref[b, pl.ds(s0, win), :].astype(jnp.float32)  # (win, bc)
            o_ref[b] = jnp.dot(
                w, xw,
                preferred_element_type=jnp.float32,
                precision=jax.lax.Precision.HIGHEST,     # ~f32-exact MXU passes
            ).astype(o_ref.dtype)
    return kernel


def moving_avg(x, kernel_size, stride, *, block_b=None, block_c=None,
               block_t=None):
    """Moving average over the time axis. x: (B, L, C) -> (B, L_out, C)."""
    B, L, C = x.shape
    pad = (kernel_size - 1) // 2
    L_pad = L + 2 * pad
    L_out = (L_pad - kernel_size) // stride + 1
    assert L_out >= 1, "moving_avg: empty output"
    itemsize = jnp.dtype(x.dtype).itemsize

    # ---- generation-aware budgets -----------------------------------------
    try:
        vmem_cap = int(pltpu.get_tpu_info().vmem_capacity_bytes)
    except Exception:
        vmem_cap = 64 << 20                      # conservative (v7x-sized)
    big_vmem = vmem_cap >= (96 << 20)            # v5e / v6e: 128 MiB physical
    step_budget = (8 << 20) if big_vmem else (4 << 20)   # in+out bytes / step

    # ---- channel tile: lane-dense (multiple of 128) whenever C >= 128 ------
    if block_c is None:
        if C >= 128:
            block_c = min((C // 128) * 128, 512)
            while block_c > 128 and L * block_c * itemsize > step_budget:
                block_c -= 128
        else:
            block_c = C      # narrow-C outputs stay masked; B and C are not
            #                  adjacent, so lane-folding would need an HBM
            #                  transpose that costs more than it saves here.
    grid_c = pl.cdiv(C, block_c)

    # ---- time tile: keep MXU contraction ~O(block_t*stride + k), not O(L) --
    if block_t is None:
        block_t = 128                      # multiple of 8 (out-spec tiling)
    if L_out <= block_t or (block_t - 1) * stride + kernel_size > L:
        grid_t, block_t, win = 1, L_out, L
    else:
        win = (block_t - 1) * stride + kernel_size
        grid_t = pl.cdiv(L_out, block_t)

    # ---- batch tile: fold batches up to the per-step byte budget -----------
    if block_b is None:
        per_b = (L + block_t) * block_c * itemsize
        block_b = max(1, min(B, step_budget // max(per_b, 1)))
        block_b = min(block_b, 16)         # bounded unrolled per-batch loop
    grid_b = pl.cdiv(B, block_b)

    w3 = jnp.asarray(_band_weights(L, L_out, kernel_size, stride, pad,
                                   grid_t, block_t, win))

    # Explicit scoped-VMEM limit: double-buffered worst case + headroom.
    # Fixes v5e's 16 MiB default without over-asking on v7x's 64 MiB part.
    in_bytes = block_b * L * block_c * itemsize
    out_bytes = block_b * block_t * block_c * itemsize
    w_bytes = block_t * win * 4
    vmem_limit = max(2 * (in_bytes + out_bytes + w_bytes) + (4 << 20), 32 << 20)
    vmem_limit = min(vmem_limit, (96 << 20) if big_vmem else (48 << 20))

    # Time blocks are independent.  Keep the time axis "arbitrary" so the x
    # tile (whose block index ignores t, innermost) is fetched from HBM only
    # once per (b, c) tile -- except when the (b, c) grid collapses to one
    # step, where marking t "parallel" lets both v7x TensorCores get work.
    t_sem = "parallel" if (grid_b * grid_c == 1 and grid_t > 1) else "arbitrary"

    kern = _make_kernel(L, pad, stride, win, block_b, block_t, grid_t)

    return pl.pallas_call(
        kern,
        out_shape=jax.ShapeDtypeStruct((B, L_out, C), x.dtype),
        grid=(grid_b, grid_c, grid_t),
        in_specs=[
            pl.BlockSpec((1, block_t, win), lambda b, c, t: (t, 0, 0)),
            pl.BlockSpec((block_b, L, block_c), lambda b, c, t: (b, 0, c)),
        ],
        out_specs=pl.BlockSpec((block_b, block_t, block_c),
                               lambda b, c, t: (b, t, c)),
        compiler_params=pltpu.CompilerParams(
            dimension_semantics=("parallel", "parallel", t_sem),
            vmem_limit_bytes=int(vmem_limit),
        ),
    )(w3, x)


if __name__ == "__main__":
    def reference(x, kernel_size, stride):
        # Pure-JAX reference matching the PyTorch module exactly.
        B, L, C = x.shape
        pad = (kernel_size - 1) // 2
        xp = jnp.concatenate(
            [jnp.broadcast_to(x[:, :1, :], (B, pad, C)),
             x,
             jnp.broadcast_to(x[:, -1:, :], (B, pad, C))], axis=1)
        out_len = (L + 2 * pad - kernel_size) // stride + 1
        return jnp.stack(
            [xp[:, t * stride: t * stride + kernel_size, :].mean(axis=1)
             for t in range(out_len)], axis=1)

    key = jax.random.PRNGKey(0)
    cases = [
        # (B,  L,   C,  kernel_size, stride)
        (2, 16, 8, 5, 1),       # small demo shape, C < 128
        (3, 32, 136, 25, 1),    # Autoformer-style k=25, C>128 not multiple of 128
        (2, 512, 256, 25, 1),   # long sequence: exercises time-tiled grid (grid_t>1)
        (2, 64, 8, 8, 4),       # even kernel + stride>1 folded into the band
    ]
    for i, (B, L, C, k, s) in enumerate(cases):
        key, sub = jax.random.split(key)
        x = jax.random.normal(sub, (B, L, C), dtype=jnp.float32)
        y = jax.block_until_ready(moving_avg(x, kernel_size=k, stride=s))
        r = reference(x, k, s)
        assert y.shape == r.shape, (i, y.shape, r.shape)
        assert jnp.allclose(y, r, atol=2e-5, rtol=2e-5), (
            i, float(jnp.max(jnp.abs(y - r))))
    print("KERNEL_OK")
</pallas_src>

<mosaic_0001>
module attributes {stable_mosaic.version = 11 : i64} {
  func.func @kernel(%arg0: i32, %arg1: i32, %arg2: i32, %arg3: memref<1x16x16xf32, #tpu.memory_space<vmem>>, %arg4: memref<2x16x8xf32, #tpu.memory_space<vmem>>, %arg5: memref<2x16x8xf32, #tpu.memory_space<vmem>>) attributes {dimension_semantics = [#tpu.dimension_semantics<parallel>, #tpu.dimension_semantics<parallel>, #tpu.dimension_semantics<arbitrary>], iteration_bounds = array<i64: 1, 1, 1>, scalar_prefetch = 0 : i64, scratch_operands = 0 : i64, tpu.core_type = #tpu.core_type<tc>, window_params = [{transform_indices = @transform_0, window_bounds = array<i64: 1, 16, 16>}, {transform_indices = @transform_1, window_bounds = array<i64: 2, 16, 8>}, {transform_indices = @transform_2, window_bounds = array<i64: 2, 16, 8>}]} {
    %c0 = arith.constant 0 : index
    %c0_0 = arith.constant 0 : index
    %c0_1 = arith.constant 0 : index
    %0 = vector.load %arg3[%c0, %c0_0, %c0_1] : memref<1x16x16xf32, #tpu.memory_space<vmem>>, vector<1x16x16xf32>
    %1 = vector.shape_cast %0 : vector<1x16x16xf32> to vector<16x16xf32>
    %c0_2 = arith.constant 0 : index
    %c0_3 = arith.constant 0 : index
    %c0_4 = arith.constant 0 : index
    %2 = vector.load %arg4[%c0_2, %c0_3, %c0_4] : memref<2x16x8xf32, #tpu.memory_space<vmem>>, vector<1x16x8xf32>
    %3 = vector.shape_cast %2 : vector<1x16x8xf32> to vector<16x8xf32>
    %cst = arith.constant dense<0.000000e+00> : vector<16x8xf32>
    %4 = tpu.matmul %1, %3, %cst {dimension_numbers = #tpu.dot_dimension_numbers<[1], [0], [0], [1], [0, 0, 1, 1], [], []>, precision = #tpu.contract_precision<fp32>} : vector<16x16xf32>, vector<16x8xf32>, vector<16x8xf32> -> vector<16x8xf32>
    %c0_5 = arith.constant 0 : index
    %c0_6 = arith.constant 0 : index
    %c0_7 = arith.constant 0 : index
    %5 = vector.load %arg5[%c0_5, %c0_6, %c0_7] : memref<2x16x8xf32, #tpu.memory_space<vmem>>, vector<1x16x8xf32>
    %6 = vector.shape_cast %5 : vector<1x16x8xf32> to vector<16x8xf32>
    %7 = vector.shape_cast %4 : vector<16x8xf32> to vector<1x16x8xf32>
    tpu.vector_store %arg5[%c0_5, %c0_6, %c0_7], %7 {strides = array<i32>} : memref<2x16x8xf32, #tpu.memory_space<vmem>>, vector<1x16x8xf32>,
    %c1 = arith.constant 1 : index
    %c0_8 = arith.constant 0 : index
    %c0_9 = arith.constant 0 : index
    %8 = vector.load %arg4[%c1, %c0_8, %c0_9] : memref<2x16x8xf32, #tpu.memory_space<vmem>>, vector<1x16x8xf32>
    %9 = vector.shape_cast %8 : vector<1x16x8xf32> to vector<16x8xf32>
    %cst_10 = arith.constant dense<0.000000e+00> : vector<16x8xf32>
    %10 = tpu.matmul %1, %9, %cst_10 {dimension_numbers = #tpu.dot_dimension_numbers<[1], [0], [0], [1], [0, 0, 1, 1], [], []>, precision = #tpu.contract_precision<fp32>} : vector<16x16xf32>, vector<16x8xf32>, vector<16x8xf32> -> vector<16x8xf32>
    %c1_11 = arith.constant 1 : index
    %c0_12 = arith.constant 0 : index
    %c0_13 = arith.constant 0 : index
    %11 = vector.load %arg5[%c1_11, %c0_12, %c0_13] : memref<2x16x8xf32, #tpu.memory_space<vmem>>, vector<1x16x8xf32>
    %12 = vector.shape_cast %11 : vector<1x16x8xf32> to vector<16x8xf32>
    %13 = vector.shape_cast %10 : vector<16x8xf32> to vector<1x16x8xf32>
    tpu.vector_store %arg5[%c1_11, %c0_12, %c0_13], %13 {strides = array<i32>} : memref<2x16x8xf32, #tpu.memory_space<vmem>>, vector<1x16x8xf32>,
    return
  }
  func.func @transform_0(%arg0: i32, %arg1: i32, %arg2: i32) -> (i32, i32, i32) {
    %c0_i32 = arith.constant 0 : i32
    %c0_i32_0 = arith.constant 0 : i32
    %c0_i32_1 = arith.constant 0 : i32
    return %arg2, %c0_i32, %c0_i32_0 : i32, i32, i32
  }
  func.func @transform_1(%arg0: i32, %arg1: i32, %arg2: i32) -> (i32, i32, i32) {
    %c0_i32 = arith.constant 0 : i32
    %c0_i32_0 = arith.constant 0 : i32
    return %arg0, %c0_i32, %arg1 : i32, i32, i32
  }
  func.func @transform_2(%arg0: i32, %arg1: i32, %arg2: i32) -> (i32, i32, i32) {
    %c0_i32 = arith.constant 0 : i32
    return %arg0, %arg2, %arg1 : i32, i32, i32
  }
}

</mosaic_0001>

<bundles_post_ra>
// kernel: tpu_custom_call.1
= control target key start
LH: loop header
LB: loop body
LE: loop exit
PB: predicated region body
PF: predicated region fallthrough
CT: control target
= control target key end

     0   :  { %vm15_vm0 = vcmask 130048   ;;  %vm524_vm1 = vcmask 64512   ;;  %s1322_s1 = inlined_call_operand.vmem [shape: f32[2,16,8], index: 1, kind: input, shape index: {}]   ;;  %s1323_s0 = inlined_call_operand.vmem [shape: f32[1,16,16], index: 0, kind: input, shape index: {}]   ;;  %s1324_s2 = inlined_call_operand.vmem [shape: f32[2,16,8], index: 2, kind: output, shape index: {}]  }
   0x1   :  { %v13_v0 = vld [vmem:[%s1322_s1] sm:$0xff]  ;;  %v14_v1 = vld [vmem:[%s1322_s1 + $0x8] sm:$0xff]  ;;  %v1039_v2 = vld [vmem:[%s1322_s1 + $0x10] sm:$0xff] }
   0x2   :  { %v23_v3 = vand.u32 4294901760, %v13_v0  ;;  %v26_v4 = vand.u32 4294901760, %v14_v1  ;;  %v1040_v5 = vld [vmem:[%s1322_s1 + $0x18] sm:$0xff]  ;;  %v531_v6 = vand.u32 4294901760, %v1039_v2  ;;  %v11_v7 = vld [vmem:[%s1323_s0] sm:$0xff]  ;;  %v12_v8 = vld [vmem:[%s1323_s0 + $0x8] sm:$0xff] }
   0x3   :  { %v534_v9 = vand.u32 4294901760, %v1040_v5  ;;  %v17_v10 = vsel %vm15_vm0, %v11_v7, 0  ;;  %v20_v11 = vsel %vm15_vm0, %v12_v8, 0 }
   0x4   :  { %v1276_v12 = vpack.c.bf16 %v26_v4, %v23_v3  ;;  %v1278_v13 = vand.u32 4294901760, %v17_v10  ;;  %v1280_v14 = vand.u32 4294901760, %v20_v11  ;;  %v111_v15 = vsub.f32 %v13_v0, %v23_v3 }
   0x5   :  { %v1282_v16 = vpack.c.bf16 %v534_v9, %v531_v6  ;;  %v118_v17 = vsub.f32 %v14_v1, %v26_v4  ;;  %v619_v18 = vsub.f32 %v1039_v2, %v531_v6  ;;  %v626_v19 = vsub.f32 %v1040_v5, %v534_v9 }
   0x6   :  { %1176 = vmatprep.subr.bf16.mxu0 %v1276_v12  ;;  %v90_v20 = vsub.f32 %v17_v10, %v1278_v13  ;;  %v100_v21 = vsub.f32 %v20_v11, %v1280_v14  ;;  %v112_v22 = vand.u32 4294901760, %v111_v15 }
   0x7   :  { %1200 = vmatprep.subr.bf16.mxu1 %v1282_v16  ;;  %1178 = vmatpush3.bf16.msra.mxu0 %v1276_v12  ;;  %v119_v23 = vand.u32 4294901760, %v118_v17  ;;  %v620_v24 = vand.u32 4294901760, %v619_v18  ;;  %v627_v25 = vand.u32 4294901760, %v626_v19  ;;  %v1183_v42 = vpack.c.bf16 %v118_v17, %v111_v15 }
   0x8   :  { %1202 = vmatpush3.bf16.msra.mxu1 %v1282_v16  ;;  %v91_v26 = vand.u32 4294901760, %v90_v20  ;;  %v101_v27 = vand.u32 4294901760, %v100_v21  ;;  %v113_v28 = vsub.f32 %v111_v15, %v112_v22  ;;  %v1207_v43 = vpack.c.bf16 %v626_v19, %v619_v18 }
   0x9   :  { %v120_v29 = vsub.f32 %v118_v17, %v119_v23  ;;  %v621_v30 = vsub.f32 %v619_v18, %v620_v24  ;;  %v628_v31 = vsub.f32 %v626_v19, %v627_v25  ;;  %v1191_v44 = vpack.c.bf16 %v119_v23, %v112_v22 }
   0xa   :  { %v92_v32 = vsub.f32 %v90_v20, %v91_v26  ;;  %v102_v33 = vsub.f32 %v100_v21, %v101_v27  ;;  %v114_v34 = vand.u32 4294901760, %v113_v28  ;;  %v1215_v45 = vpack.c.bf16 %v627_v25, %v620_v24 }
   0xb   :  { %v121_v35 = vand.u32 4294901760, %v120_v29  ;;  %v622_v36 = vand.u32 4294901760, %v621_v30  ;;  %v629_v37 = vand.u32 4294901760, %v628_v31 }
   0xc   :  { %v93_v38 = vand.u32 4294901760, %v92_v32  ;;  %v103_v39 = vand.u32 4294901760, %v102_v33 }
   0xd   :  { %v1179_v40 = vpack.c.bf16 %v121_v35, %v114_v34  ;;  %v1203_v41 = vpack.c.bf16 %v629_v37, %v622_v36 }
   0xe   :  { %1095 = vmatprep.mubr.f32.mxu0 %v93_v38  ;;  %1137 = vmatprep.mubr.f32.mxu1 %v93_v38 }
   0xf   :  { %1096 = vmatmul.mubr.f32.vlgmr.msra.gmra.mrb[0].mxu0 %v103_v39  ;;  %1180 = vmatprep.subr.bf16.mxu0 %v1179_v40 }
  0x10   :  { %1138 = vmatmul.mubr.f32.vlgmr.msra.gmra.mrb[0].mxu1 %v103_v39  ;;  %1204 = vmatprep.subr.bf16.mxu1 %v1203_v41 }
  0x11   :  { %1182 = vmatpush3.bf16.msra.mxu0 %v1179_v40  ;;  %1206 = vmatpush3.bf16.msra.mxu1 %v1203_v41 }
  0x12   :  { %1102 = vmatprep.mubr.f32.mxu0 %v1278_v13  ;;  %1144 = vmatprep.mubr.f32.mxu1 %v1278_v13 }
  0x13   :  { %1184 = vmatprep.subr.bf16.mxu0 %v1183_v42  ;;  %1208 = vmatprep.subr.bf16.mxu1 %v1207_v43 }
  0x17   :  { %1103 = vmatmul.mubr.f32.vlgmr.msra.gmra.mrb[0].mxu0 %v1280_v14 }
  0x18   :  { %1145 = vmatmul.mubr.f32.vlgmr.msra.gmra.mrb[0].mxu1 %v1280_v14  ;;  %1186 = vmatpush3.bf16.msra.mxu0 %v1183_v42 }
  0x19   :  { %1210 = vmatpush3.bf16.msra.mxu1 %v1207_v43  ;;  %1109 = vmatprep.mubr.f32.mxu0 %v90_v20 }
  0x1a   :  { %1151 = vmatprep.mubr.f32.mxu1 %v90_v20  ;;  %1188 = vmatprep.subr.bf16.mxu0 %v1276_v12 }
  0x1b   :  { %1212 = vmatprep.subr.bf16.mxu1 %v1282_v16 }
  0x1f   :  { %1110 = vmatmul.mubr.f32.vlgmr.msra.gmra.mrb[0].mxu0 %v100_v21 }
  0x20   :  { %1152 = vmatmul.mubr.f32.vlgmr.msra.gmra.mrb[0].mxu1 %v100_v21  ;;  %1190 = vmatpush3.bf16.msra.mxu0 %v1276_v12 }
  0x21   :  { %1214 = vmatpush3.bf16.msra.mxu1 %v1282_v16  ;;  %1116 = vmatprep.mubr.f32.mxu0 %v91_v26 }
  0x22   :  { %1158 = vmatprep.mubr.f32.mxu1 %v91_v26  ;;  %1192 = vmatprep.subr.bf16.mxu0 %v1191_v44 }
  0x23   :  { %1216 = vmatprep.subr.bf16.mxu1 %v1215_v45 }
  0x27   :  { %1117 = vmatmul.mubr.f32.vlgmr.msra.gmra.mrb[0].mxu0 %v101_v27 }
  0x28   :  { %1159 = vmatmul.mubr.f32.vlgmr.msra.gmra.mrb[0].mxu1 %v101_v27  ;;  %1194 = vmatpush3.bf16.msra.mxu0 %v1191_v44 }
  0x29   :  { %1218 = vmatpush3.bf16.msra.mxu1 %v1215_v45  ;;  %1123 = vmatprep.mubr.f32.mxu0 %v1278_v13 }
  0x2a   :  { %1165 = vmatprep.mubr.f32.mxu1 %v1278_v13  ;;  %1196 = vmatprep.subr.bf16.mxu0 %v1276_v12 }
  0x2b   :  { %1220 = vmatprep.subr.bf16.mxu1 %v1282_v16 }
  0x2f   :  { %1124 = vmatmul.mubr.f32.vlgmr.msra.gmra.mrb[0].mxu0 %v1280_v14 }
  0x30   :  { %1166 = vmatmul.mubr.f32.vlgmr.msra.gmra.mrb[0].mxu1 %v1280_v14  ;;  %1198 = vmatpush3.bf16.msra.mxu0 %v1276_v12 }
  0x31   :  { %1222 = vmatpush3.bf16.msra.mxu1 %v1282_v16  ;;  %1130 = vmatprep.mubr.f32.mxu0 %v1278_v13 }
  0x32   :  { %1172 = vmatprep.mubr.f32.mxu1 %v1278_v13 }
  0x37   :  { %1131 = vmatmul.mubr.f32.vlgmr.msra.gmra.mrb[0].mxu0 %v1280_v14 }
  0x38   :  { %1173 = vmatmul.mubr.f32.vlgmr.msra.gmra.mrb[0].mxu1 %v1280_v14 }
 0x10a   :  { %v1132_v46 = vpop.f32.mrb[0].mxu0 }
 0x10b   :  { %526 = vst.msk [vmem:[%s1324_s2 + $0x8] sm:$0xff] %vm524_vm1, %v1132_v46  ;;  %v1174_v47 = vpop.f32.mrb[0].mxu1  ;;  %v514_v48 = vpop.f32.mrb[1].mxu0 }
 0x10c   :  { %1042 = vst.msk [vmem:[%s1324_s2 + $0x18] sm:$0xff] %vm524_vm1, %v1174_v47  ;;  %525 = vst.msk [vmem:[%s1324_s2] sm:$0xff] %vm524_vm1, %v514_v48  ;;  %v1022_v49 = vpop.f32.mrb[1].mxu1 }
 0x10d   :  { %1041 = vst.msk [vmem:[%s1324_s2 + $0x10] sm:$0xff] %vm524_vm1, %v1022_v49 }

</bundles_post_ra>
